<compile_context>
chip_gen: v7x
topology: tpu7x:2x2x1
jax: 0.10.0
libtpu: 0.0.40
codegen_flags: <defaults>
</compile_context>

<pallas_src>
import math
import functools

import jax
import jax.numpy as jnp
from jax.experimental import pallas as pl
from jax.experimental.pallas import tpu as pltpu

_LANE = 128
_SUBLANE = 8
_V7X_SAFE_VMEM = 56 << 20        # headroom under v7x's 64 MiB physical VMEM


def _round_up(x, m):
    return (x + m - 1) // m * m


def _mup_fused_kernel(*refs, num_layers):
    """Whole MuP DNN for one batch tile.

    refs = (x_ref, w0_ref, b0_ref, ..., w_{L-1}_ref, b_{L-1}_ref, o_ref).
    MuP scales are pre-folded into the (padded) weights / biases, so the body
    is just: h = relu(h @ W_k + b_k) for k < L-1; o = h @ W_{L-1} + b_{L-1}.
    The Python loop unrolls at trace time; `h` stays in vregs throughout.
    """
    x_ref = refs[0]
    o_ref = refs[-1]
    h = x_ref[...]
    for k in range(num_layers):
        w_ref = refs[1 + 2 * k]
        b_ref = refs[2 + 2 * k]
        h = jnp.dot(h.astype(w_ref.dtype), w_ref[...],
                    preferred_element_type=jnp.float32)
        h = h + b_ref[...]                      # (1, Dout) broadcast
        if k != num_layers - 1:
            h = jnp.maximum(h, 0.0)             # ReLU in f32 on the VPU
    o_ref[...] = h.astype(o_ref.dtype)


def init_mup_params(sizes, key, dtype=jnp.float32):
    """Replicates MuP_Relu_DNN.__init__: the effective init of every layer is
    kaiming_normal(fan_in, relu) => N(0, 2/fan_in) (the layer-0 fan_out init
    is overwritten); bias = 0.  Weights stored transposed (in, out) so the
    kernel computes y = x @ Wt + b."""
    params = []
    length = len(sizes) - 1
    for k in range(length):
        key, sub = jax.random.split(key)
        fan_in, fan_out = sizes[k], sizes[k + 1]
        std = math.sqrt(2.0 / fan_in)
        w_t = (std * jax.random.normal(sub, (fan_in, fan_out))).astype(dtype)
        b = jnp.zeros((1, fan_out), dtype=dtype)
        params.append((w_t, b))
    return params


def _layer_scale(k, sizes):
    length = len(sizes) - 1
    s = 1.0
    if k == 0:
        s *= math.sqrt(sizes[1])                # h *= sqrt(sizes[1])
    if k == length - 1:
        s /= math.sqrt(sizes[k])                # h /= sqrt(sizes[length-1])
    return s


def prepare_mup_params(params, sizes, compute_dtype=jnp.bfloat16):
    """Fold MuP scales into (W, b) and zero-pad EVERY dim (including the
    layer-0 input dim) up to a multiple of 128 lanes.  Padded rows/cols are
    numerically inert (bias pad = 0, ReLU(0) = 0, padded weight rows = 0).
    Call ONCE per parameter set and reuse across forward calls."""
    length = len(sizes) - 1
    prepared = []
    for k in range(length):
        w_t, b = params[k]                          # (Din, Dout), (1, Dout)
        scale = _layer_scale(k, sizes)
        din = _round_up(sizes[k], _LANE)
        dout = _round_up(sizes[k + 1], _LANE)
        w_p = jnp.zeros((din, dout), compute_dtype)
        w_p = w_p.at[:sizes[k], :sizes[k + 1]].set(
            (w_t * scale).astype(compute_dtype))
        b_p = jnp.zeros((1, dout), compute_dtype)
        b_p = b_p.at[:, :sizes[k + 1]].set((b * scale).astype(compute_dtype))
        prepared.append((w_p, b_p))
    return prepared


def _choose_batch_tiling(batch, compute_dtype, block_m):
    """Pick (tile_m, padded_batch).  Keeps the grid >= 2 whenever the batch
    spans more than one sublane group (so v7x's second TensorCore is used and
    awkward sizes don't round up to a whole extra tile)."""
    if block_m is None:
        is_bf16 = jnp.dtype(compute_dtype) == jnp.dtype(jnp.bfloat16)
        block_m = 256 if is_bf16 else 128       # f32 h-tiles use 2x the vregs
    bp = _round_up(batch, _SUBLANE)
    if _SUBLANE < bp <= 2 * block_m:
        tm = _round_up(pl.cdiv(bp, 2), _SUBLANE)   # exactly two tiles
    else:
        tm = min(bp, block_m)
    bp = _round_up(bp, tm)
    return tm, bp


def mup_relu_dnn_forward(x, prepared, sizes, *, block_m=None):
    """x: (B, sizes[0]) -> (B, sizes[-1]) in f32; one fused pallas_call.
    `prepared` comes from prepare_mup_params()."""
    length = len(sizes) - 1
    assert len(prepared) == length
    B, din = x.shape
    assert din == sizes[0]

    compute_dtype = prepared[0][0].dtype
    itemsize = jnp.dtype(compute_dtype).itemsize
    din_p = prepared[0][0].shape[0]
    dout_last_p = prepared[-1][0].shape[1]

    tm, bp = _choose_batch_tiling(B, compute_dtype, block_m)

    xp = x.astype(compute_dtype)
    if bp != B or din_p != din:
        xp = jnp.pad(xp, ((0, bp - B), (0, din_p - din)))

    flat_params = []
    for w_p, b_p in prepared:
        flat_params += [w_p, b_p]

    # --- VMEM budget (worst case: params double-buffered) + cost estimate ---
    param_bytes = sum(a.size * a.dtype.itemsize for a in flat_params)
    vmem_needed = (2 * param_bytes
                   + 2 * tm * din_p * itemsize        # double-buffered x tile
                   + 2 * tm * dout_last_p * itemsize  # double-buffered out
                   + (1 << 20))                       # compiler scratch slack
    assert vmem_needed <= _V7X_SAFE_VMEM, (
        f"resident-parameter scheme needs {vmem_needed} B VMEM; "
        f"exceeds v7x budget {_V7X_SAFE_VMEM} B — shrink block_m or split layers")
    vmem_limit = int(min(max(2 * vmem_needed, 32 << 20), _V7X_SAFE_VMEM))

    flops = 2 * bp * sum(w.shape[0] * w.shape[1] for w, _ in prepared)
    bytes_accessed = (xp.size * itemsize + param_bytes
                      + bp * dout_last_p * itemsize)
    cost = pl.CostEstimate(flops=flops, transcendentals=0,
                           bytes_accessed=bytes_accessed)

    kernel = functools.partial(_mup_fused_kernel, num_layers=length)

    def _build(single_buffer_params):
        in_specs = [pl.BlockSpec((tm, din_p), lambda i: (i, 0))]
        for w_p, b_p in prepared:
            for arr in (w_p, b_p):
                if single_buffer_params:
                    spec = pl.BlockSpec(arr.shape, lambda i: (0, 0),
                                        pipeline_mode=pl.Buffered(buffer_count=1))
                else:
                    spec = pl.BlockSpec(arr.shape, lambda i: (0, 0))
                in_specs.append(spec)
        return pl.pallas_call(
            kernel,
            out_shape=jax.ShapeDtypeStruct((bp, dout_last_p), compute_dtype),
            grid=(bp // tm,),
            in_specs=in_specs,
            out_specs=pl.BlockSpec((tm, dout_last_p), lambda i: (i, 0)),
            compiler_params=pltpu.CompilerParams(
                dimension_semantics=("parallel",),
                vmem_limit_bytes=vmem_limit),
            cost_estimate=cost,
        )

    try:
        # Preferred: grid-invariant weights/biases single-buffered.
        out_p = _build(True)(xp, *flat_params)
    except Exception:
        # Fallback if this JAX version rejects pipeline_mode / Buffered(1).
        out_p = _build(False)(xp, *flat_params)

    # Strip batch + lane padding; return f32 regardless of compute dtype.
    return out_p[:B, :sizes[-1]].astype(jnp.float32)


def mup_relu_dnn_reference(x, params, sizes):
    """Plain-JAX reference matching the PyTorch forward exactly."""
    length = len(sizes) - 1
    h = x
    for k in range(length):
        w_t, b = params[k]
        h = h @ w_t + b
        if k == 0:
            h = h * math.sqrt(sizes[1])
        if k != length - 1:
            h = jnp.maximum(h, 0.0)
        else:
            h = h / math.sqrt(sizes[k])
    return h


if __name__ == "__main__":
    sizes = [32, 64, 64, 16]          # input dim, two hidden layers, output dim
    batch = 8

    key = jax.random.PRNGKey(0)
    key_x, key_p = jax.random.split(key)
    x = jax.random.normal(key_x, (batch, sizes[0]), dtype=jnp.float32)
    params = init_mup_params(sizes, key_p)
    ref = mup_relu_dnn_reference(x, params, sizes)

    # Default path: bf16 params / MXU, f32 accumulation.  Prep once, reuse.
    prepared_bf16 = prepare_mup_params(params, sizes, jnp.bfloat16)
    out = jax.block_until_ready(mup_relu_dnn_forward(x, prepared_bf16, sizes))
    assert out.shape == (batch, sizes[-1])
    assert jnp.allclose(out, ref, atol=5e-2, rtol=5e-2)

    # f32 compute path: tight tolerance check of the fused kernel structure.
    prepared_f32 = prepare_mup_params(params, sizes, jnp.float32)
    out_f32 = jax.block_until_ready(mup_relu_dnn_forward(x, prepared_f32, sizes))
    assert jnp.allclose(out_f32, ref, atol=1e-4, rtol=1e-4)

    print("KERNEL_OK")
</pallas_src>

<mosaic_0001>
module attributes {stable_mosaic.version = 11 : i64} {
  func.func @_mup_fused_kernel(%arg0: i32, %arg1: memref<8x128xbf16, #tpu.memory_space<vmem>>, %arg2: memref<128x128xbf16, #tpu.memory_space<vmem>>, %arg3: memref<1x128xbf16, #tpu.memory_space<vmem>>, %arg4: memref<128x128xbf16, #tpu.memory_space<vmem>>, %arg5: memref<1x128xbf16, #tpu.memory_space<vmem>>, %arg6: memref<128x128xbf16, #tpu.memory_space<vmem>>, %arg7: memref<1x128xbf16, #tpu.memory_space<vmem>>, %arg8: memref<8x128xbf16, #tpu.memory_space<vmem>>) attributes {dimension_semantics = [#tpu.dimension_semantics<parallel>], iteration_bounds = array<i64: 1>, scalar_prefetch = 0 : i64, scratch_operands = 0 : i64, tpu.core_type = #tpu.core_type<tc>, window_params = [{transform_indices = @transform_0, window_bounds = array<i64: 8, 128>}, {pipeline_mode = #tpu.pipeline_mode<synchronous>, transform_indices = @transform_1, window_bounds = array<i64: 128, 128>}, {pipeline_mode = #tpu.pipeline_mode<synchronous>, transform_indices = @transform_2, window_bounds = array<i64: 1, 128>}, {pipeline_mode = #tpu.pipeline_mode<synchronous>, transform_indices = @transform_3, window_bounds = array<i64: 128, 128>}, {pipeline_mode = #tpu.pipeline_mode<synchronous>, transform_indices = @transform_4, window_bounds = array<i64: 1, 128>}, {pipeline_mode = #tpu.pipeline_mode<synchronous>, transform_indices = @transform_5, window_bounds = array<i64: 128, 128>}, {pipeline_mode = #tpu.pipeline_mode<synchronous>, transform_indices = @transform_6, window_bounds = array<i64: 1, 128>}, {transform_indices = @transform_7, window_bounds = array<i64: 8, 128>}]} {
    %c0 = arith.constant 0 : index
    %c0_0 = arith.constant 0 : index
    %0 = vector.load %arg1[%c0, %c0_0] : memref<8x128xbf16, #tpu.memory_space<vmem>>, vector<8x128xbf16>
    %c0_1 = arith.constant 0 : index
    %c0_2 = arith.constant 0 : index
    %1 = vector.load %arg2[%c0_1, %c0_2] : memref<128x128xbf16, #tpu.memory_space<vmem>>, vector<128x128xbf16>
    %cst = arith.constant dense<0.000000e+00> : vector<8x128xf32>
    %2 = tpu.matmul %0, %1, %cst {dimension_numbers = #tpu.dot_dimension_numbers<[1], [0], [0], [1], [0, 0, 1, 1], [], []>} : vector<8x128xbf16>, vector<128x128xbf16>, vector<8x128xf32> -> vector<8x128xf32>
    %c0_3 = arith.constant 0 : index
    %c0_4 = arith.constant 0 : index
    %3 = vector.load %arg3[%c0_3, %c0_4] : memref<1x128xbf16, #tpu.memory_space<vmem>>, vector<1x128xbf16>
    %4 = arith.extf %3 : vector<1x128xbf16> to vector<1x128xf32>
    %5 = vector.broadcast %4 : vector<1x128xf32> to vector<8x128xf32>
    %6 = arith.addf %2, %5 : vector<8x128xf32>
    %cst_5 = arith.constant 0.000000e+00 : f32
    %7 = vector.broadcast %cst_5 : f32 to vector<8x128xf32>
    %8 = arith.maximumf %6, %7 : vector<8x128xf32>
    %9 = arith.truncf %8 : vector<8x128xf32> to vector<8x128xbf16>
    %c0_6 = arith.constant 0 : index
    %c0_7 = arith.constant 0 : index
    %10 = vector.load %arg4[%c0_6, %c0_7] : memref<128x128xbf16, #tpu.memory_space<vmem>>, vector<128x128xbf16>
    %cst_8 = arith.constant dense<0.000000e+00> : vector<8x128xf32>
    %11 = tpu.matmul %9, %10, %cst_8 {dimension_numbers = #tpu.dot_dimension_numbers<[1], [0], [0], [1], [0, 0, 1, 1], [], []>} : vector<8x128xbf16>, vector<128x128xbf16>, vector<8x128xf32> -> vector<8x128xf32>
    %c0_9 = arith.constant 0 : index
    %c0_10 = arith.constant 0 : index
    %12 = vector.load %arg5[%c0_9, %c0_10] : memref<1x128xbf16, #tpu.memory_space<vmem>>, vector<1x128xbf16>
    %13 = arith.extf %12 : vector<1x128xbf16> to vector<1x128xf32>
    %14 = vector.broadcast %13 : vector<1x128xf32> to vector<8x128xf32>
    %15 = arith.addf %11, %14 : vector<8x128xf32>
    %cst_11 = arith.constant 0.000000e+00 : f32
    %16 = vector.broadcast %cst_11 : f32 to vector<8x128xf32>
    %17 = arith.maximumf %15, %16 : vector<8x128xf32>
    %18 = arith.truncf %17 : vector<8x128xf32> to vector<8x128xbf16>
    %c0_12 = arith.constant 0 : index
    %c0_13 = arith.constant 0 : index
    %19 = vector.load %arg6[%c0_12, %c0_13] : memref<128x128xbf16, #tpu.memory_space<vmem>>, vector<128x128xbf16>
    %cst_14 = arith.constant dense<0.000000e+00> : vector<8x128xf32>
    %20 = tpu.matmul %18, %19, %cst_14 {dimension_numbers = #tpu.dot_dimension_numbers<[1], [0], [0], [1], [0, 0, 1, 1], [], []>} : vector<8x128xbf16>, vector<128x128xbf16>, vector<8x128xf32> -> vector<8x128xf32>
    %c0_15 = arith.constant 0 : index
    %c0_16 = arith.constant 0 : index
    %21 = vector.load %arg7[%c0_15, %c0_16] : memref<1x128xbf16, #tpu.memory_space<vmem>>, vector<1x128xbf16>
    %22 = arith.extf %21 : vector<1x128xbf16> to vector<1x128xf32>
    %23 = vector.broadcast %22 : vector<1x128xf32> to vector<8x128xf32>
    %24 = arith.addf %20, %23 : vector<8x128xf32>
    %25 = arith.truncf %24 : vector<8x128xf32> to vector<8x128xbf16>
    %c0_17 = arith.constant 0 : index
    %c0_18 = arith.constant 0 : index
    %26 = vector.load %arg8[%c0_17, %c0_18] : memref<8x128xbf16, #tpu.memory_space<vmem>>, vector<8x128xbf16>
    tpu.vector_store %arg8[%c0_17, %c0_18], %25 {strides = array<i32>} : memref<8x128xbf16, #tpu.memory_space<vmem>>, vector<8x128xbf16>,
    return
  }
  func.func @transform_0(%arg0: i32) -> (i32, i32) {
    %c0_i32 = arith.constant 0 : i32
    %c0_i32_0 = arith.constant 0 : i32
    return %arg0, %c0_i32 : i32, i32
  }
  func.func @transform_1(%arg0: i32) -> (i32, i32) {
    %c0_i32 = arith.constant 0 : i32
    %c0_i32_0 = arith.constant 0 : i32
    %c0_i32_1 = arith.constant 0 : i32
    return %c0_i32, %c0_i32_0 : i32, i32
  }
  func.func @transform_2(%arg0: i32) -> (i32, i32) {
    %c0_i32 = arith.constant 0 : i32
    %c0_i32_0 = arith.constant 0 : i32
    %c0_i32_1 = arith.constant 0 : i32
    return %c0_i32, %c0_i32_0 : i32, i32
  }
  func.func @transform_3(%arg0: i32) -> (i32, i32) {
    %c0_i32 = arith.constant 0 : i32
    %c0_i32_0 = arith.constant 0 : i32
    %c0_i32_1 = arith.constant 0 : i32
    return %c0_i32, %c0_i32_0 : i32, i32
  }
  func.func @transform_4(%arg0: i32) -> (i32, i32) {
    %c0_i32 = arith.constant 0 : i32
    %c0_i32_0 = arith.constant 0 : i32
    %c0_i32_1 = arith.constant 0 : i32
    return %c0_i32, %c0_i32_0 : i32, i32
  }
  func.func @transform_5(%arg0: i32) -> (i32, i32) {
    %c0_i32 = arith.constant 0 : i32
    %c0_i32_0 = arith.constant 0 : i32
    %c0_i32_1 = arith.constant 0 : i32
    return %c0_i32, %c0_i32_0 : i32, i32
  }
  func.func @transform_6(%arg0: i32) -> (i32, i32) {
    %c0_i32 = arith.constant 0 : i32
    %c0_i32_0 = arith.constant 0 : i32
    %c0_i32_1 = arith.constant 0 : i32
    return %c0_i32, %c0_i32_0 : i32, i32
  }
  func.func @transform_7(%arg0: i32) -> (i32, i32) {
    %c0_i32 = arith.constant 0 : i32
    %c0_i32_0 = arith.constant 0 : i32
    return %arg0, %c0_i32 : i32, i32
  }
}

module attributes {stable_mosaic.version = 11 : i64} {
  func.func @_mup_fused_kernel(%arg0: i32, %arg1: memref<8x128xbf16, #tpu.memory_space<vmem>>, %arg2: memref<128x128xbf16, #tpu.memory_space<vmem>>, %arg3: memref<1x128xbf16, #tpu.memory_space<vmem>>, %arg4: memref<128x128xbf16, #tpu.memory_space<vmem>>, %arg5: memref<1x128xbf16, #tpu.memory_space<vmem>>, %arg6: memref<128x128xbf16, #tpu.memory_space<vmem>>, %arg7: memref<1x128xbf16, #tpu.memory_space<vmem>>, %arg8: memref<8x128xbf16, #tpu.memory_space<vmem>>) attributes {dimension_semantics = [#tpu.dimension_semantics<parallel>], iteration_bounds = array<i64: 1>, scalar_prefetch = 0 : i64, scratch_operands = 0 : i64, tpu.core_type = #tpu.core_type<tc>, window_params = [{transform_indices = @transform_0, window_bounds = array<i64: 8, 128>}, {pipeline_mode = #tpu.pipeline_mode<synchronous>, transform_indices = @transform_1, window_bounds = array<i64: 128, 128>}, {pipeline_mode = #tpu.pipeline_mode<synchronous>, transform_indices = @transform_2, window_bounds = array<i64: 1, 128>}, {pipeline_mode = #tpu.pipeline_mode<synchronous>, transform_indices = @transform_3, window_bounds = array<i64: 128, 128>}, {pipeline_mode = #tpu.pipeline_mode<synchronous>, transform_indices = @transform_4, window_bounds = array<i64: 1, 128>}, {pipeline_mode = #tpu.pipeline_mode<synchronous>, transform_indices = @transform_5, window_bounds = array<i64: 128, 128>}, {pipeline_mode = #tpu.pipeline_mode<synchronous>, transform_indices = @transform_6, window_bounds = array<i64: 1, 128>}, {transform_indices = @transform_7, window_bounds = array<i64: 8, 128>}]} {
    %c0 = arith.constant 0 : index
    %c0_0 = arith.constant 0 : index
    %0 = vector.load %arg1[%c0, %c0_0] : memref<8x128xbf16, #tpu.memory_space<vmem>>, vector<8x128xbf16>
    %c0_1 = arith.constant 0 : index
    %c0_2 = arith.constant 0 : index
    %1 = vector.load %arg2[%c0_1, %c0_2] : memref<128x128xbf16, #tpu.memory_space<vmem>>, vector<128x128xbf16>
    %cst = arith.constant dense<0.000000e+00> : vector<8x128xf32>
    %2 = tpu.matmul %0, %1, %cst {dimension_numbers = #tpu.dot_dimension_numbers<[1], [0], [0], [1], [0, 0, 1, 1], [], []>} : vector<8x128xbf16>, vector<128x128xbf16>, vector<8x128xf32> -> vector<8x128xf32>
    %c0_3 = arith.constant 0 : index
    %c0_4 = arith.constant 0 : index
    %3 = vector.load %arg3[%c0_3, %c0_4] : memref<1x128xbf16, #tpu.memory_space<vmem>>, vector<1x128xbf16>
    %4 = arith.extf %3 : vector<1x128xbf16> to vector<1x128xf32>
    %5 = vector.broadcast %4 : vector<1x128xf32> to vector<8x128xf32>
    %6 = arith.addf %2, %5 : vector<8x128xf32>
    %cst_5 = arith.constant 0.000000e+00 : f32
    %7 = vector.broadcast %cst_5 : f32 to vector<8x128xf32>
    %8 = arith.maximumf %6, %7 : vector<8x128xf32>
    %9 = arith.truncf %8 : vector<8x128xf32> to vector<8x128xbf16>
    %c0_6 = arith.constant 0 : index
    %c0_7 = arith.constant 0 : index
    %10 = vector.load %arg4[%c0_6, %c0_7] : memref<128x128xbf16, #tpu.memory_space<vmem>>, vector<128x128xbf16>
    %cst_8 = arith.constant dense<0.000000e+00> : vector<8x128xf32>
    %11 = tpu.matmul %9, %10, %cst_8 {dimension_numbers = #tpu.dot_dimension_numbers<[1], [0], [0], [1], [0, 0, 1, 1], [], []>} : vector<8x128xbf16>, vector<128x128xbf16>, vector<8x128xf32> -> vector<8x128xf32>
    %c0_9 = arith.constant 0 : index
    %c0_10 = arith.constant 0 : index
    %12 = vector.load %arg5[%c0_9, %c0_10] : memref<1x128xbf16, #tpu.memory_space<vmem>>, vector<1x128xbf16>
    %13 = arith.extf %12 : vector<1x128xbf16> to vector<1x128xf32>
    %14 = vector.broadcast %13 : vector<1x128xf32> to vector<8x128xf32>
    %15 = arith.addf %11, %14 : vector<8x128xf32>
    %cst_11 = arith.constant 0.000000e+00 : f32
    %16 = vector.broadcast %cst_11 : f32 to vector<8x128xf32>
    %17 = arith.maximumf %15, %16 : vector<8x128xf32>
    %18 = arith.truncf %17 : vector<8x128xf32> to vector<8x128xbf16>
    %c0_12 = arith.constant 0 : index
    %c0_13 = arith.constant 0 : index
    %19 = vector.load %arg6[%c0_12, %c0_13] : memref<128x128xbf16, #tpu.memory_space<vmem>>, vector<128x128xbf16>
    %cst_14 = arith.constant dense<0.000000e+00> : vector<8x128xf32>
    %20 = tpu.matmul %18, %19, %cst_14 {dimension_numbers = #tpu.dot_dimension_numbers<[1], [0], [0], [1], [0, 0, 1, 1], [], []>} : vector<8x128xbf16>, vector<128x128xbf16>, vector<8x128xf32> -> vector<8x128xf32>
    %c0_15 = arith.constant 0 : index
    %c0_16 = arith.constant 0 : index
    %21 = vector.load %arg7[%c0_15, %c0_16] : memref<1x128xbf16, #tpu.memory_space<vmem>>, vector<1x128xbf16>
    %22 = arith.extf %21 : vector<1x128xbf16> to vector<1x128xf32>
    %23 = vector.broadcast %22 : vector<1x128xf32> to vector<8x128xf32>
    %24 = arith.addf %20, %23 : vector<8x128xf32>
    %25 = arith.truncf %24 : vector<8x128xf32> to vector<8x128xbf16>
    %c0_17 = arith.constant 0 : index
    %c0_18 = arith.constant 0 : index
    %26 = vector.load %arg8[%c0_17, %c0_18] : memref<8x128xbf16, #tpu.memory_space<vmem>>, vector<8x128xbf16>
    tpu.vector_store %arg8[%c0_17, %c0_18], %25 {strides = array<i32>} : memref<8x128xbf16, #tpu.memory_space<vmem>>, vector<8x128xbf16>,
    return
  }
  func.func @transform_0(%arg0: i32) -> (i32, i32) {
    %c0_i32 = arith.constant 0 : i32
    %c0_i32_0 = arith.constant 0 : i32
    return %arg0, %c0_i32 : i32, i32
  }
  func.func @transform_1(%arg0: i32) -> (i32, i32) {
    %c0_i32 = arith.constant 0 : i32
    %c0_i32_0 = arith.constant 0 : i32
    %c0_i32_1 = arith.constant 0 : i32
    return %c0_i32, %c0_i32_0 : i32, i32
  }
  func.func @transform_2(%arg0: i32) -> (i32, i32) {
    %c0_i32 = arith.constant 0 : i32
    %c0_i32_0 = arith.constant 0 : i32
    %c0_i32_1 = arith.constant 0 : i32
    return %c0_i32, %c0_i32_0 : i32, i32
  }
  func.func @transform_3(%arg0: i32) -> (i32, i32) {
    %c0_i32 = arith.constant 0 : i32
    %c0_i32_0 = arith.constant 0 : i32
    %c0_i32_1 = arith.constant 0 : i32
    return %c0_i32, %c0_i32_0 : i32, i32
  }
  func.func @transform_4(%arg0: i32) -> (i32, i32) {
    %c0_i32 = arith.constant 0 : i32
    %c0_i32_0 = arith.constant 0 : i32
    %c0_i32_1 = arith.constant 0 : i32
    return %c0_i32, %c0_i32_0 : i32, i32
  }
  func.func @transform_5(%arg0: i32) -> (i32, i32) {
    %c0_i32 = arith.constant 0 : i32
    %c0_i32_0 = arith.constant 0 : i32
    %c0_i32_1 = arith.constant 0 : i32
    return %c0_i32, %c0_i32_0 : i32, i32
  }
  func.func @transform_6(%arg0: i32) -> (i32, i32) {
    %c0_i32 = arith.constant 0 : i32
    %c0_i32_0 = arith.constant 0 : i32
    %c0_i32_1 = arith.constant 0 : i32
    return %c0_i32, %c0_i32_0 : i32, i32
  }
  func.func @transform_7(%arg0: i32) -> (i32, i32) {
    %c0_i32 = arith.constant 0 : i32
    %c0_i32_0 = arith.constant 0 : i32
    return %arg0, %c0_i32 : i32, i32
  }
}

</mosaic_0001>

<bundles_post_ra>
// kernel: tpu_custom_call.1
= control target key start
LH: loop header
LB: loop body
LE: loop exit
PB: predicated region body
PF: predicated region fallthrough
CT: control target
= control target key end

     0   :  { %12 = vsyncpa [#allocation3], 0  ;;  %s854_s0 = inlined_call_operand.hbm [shape: bf16[8,128], index: 0, kind: input, shape index: {}]   ;;  %s855_s1 = inlined_call_operand.hbm [shape: bf16[128,128], index: 1, kind: input, shape index: {}]   ;;  %s856_s2 = inlined_call_operand.vmem [shape: bf16[1,128], index: 2, kind: input, shape index: {}]   ;;  %s857_s3 = inlined_call_operand.hbm [shape: bf16[128,128], index: 3, kind: input, shape index: {}]   ;;  %s858_s4 = inlined_call_operand.vmem [shape: bf16[1,128], index: 4, kind: input, shape index: {}]   ;;  %s859_s5 = inlined_call_operand.hbm [shape: bf16[128,128], index: 5, kind: input, shape index: {}]   ;;  %s860_s6 = inlined_call_operand.vmem [shape: bf16[1,128], index: 6, kind: input, shape index: {}]   ;;  %s861_s7 = inlined_call_operand.hbm [shape: bf16[8,128], index: 7, kind: output, shape index: {}]  }
   0x1   :  { %13 = vsyncpa [#allocation6], 0 }
   0x2   :  { %14 = vsyncpa [#allocation9], 0 }
   0x3   :  { %15 = vsyncpa [#allocation4], 0  ;;  %s697_s24 = smov [#allocation5]   ;;  %s579_s28 = scalar_lea.hbm %s855_s1, 1024 }
   0x4   :  { %s31_s25 = sshll.u32 %s697_s24, 4  ;;  %p580_p0 = scmp.ne.s32.totalorder %s855_s1, %s579_s28  ;;  %s32_s25 = int_to_ptr.vmem [resolvable:$true] %s31_s25 }
   0x5   :  { %p583_p1 = scmp.lt.u32.totalorder %s579_s28, %s855_s1 }
   0x7   :  { %p585_p2 = pnand %p583_p1, %p580_p0 }
   0x9   :  { %588 = shalt.err (!%p585_p2)
}
   0xa   :  { %s589_s10 = scalar_lea.vmem %s32_s25, 1024  ;;  %p594_p4 = scmp.lt.s32.totalorder %s32_s25, %s32_s25 }
   0xb   :  { %p590_p3 = scmp.ne.s32.totalorder %s32_s25, %s589_s10  ;;  %p595_p5 = scmp.lt.s32.totalorder %s589_s10, %s589_s10 }
   0xd   :  { %p596_p6 = por %p595_p5, %p594_p4 }
   0xf   :  { %p597_p7 = pnand %p596_p6, %p590_p3 }
  0x11   :  { %600 = shalt.err (!%p597_p7)
}
  0x12   :  { %s698_s11 = smov 64   ;;  %s699_s12 = smov 4  }
  0x13   :  { %37 = dma.hbm_to_vmem [thread:$0]  %s855_s1, 1024, %s32_s25, [#allocation6], %s698_s11, %s698_s11, %s699_s12  }
  0x14   :  { %s700_s15 = smov [#allocation2]   ;;  %s701_s17 = smov [#allocation7]  }
  0x15   :  { %s22_s16 = sshll.u32 %s700_s15, 4  ;;  %s45_s18 = sshll.u32 %s701_s17, 4  ;;  %s23_s16 = int_to_ptr.vmem [resolvable:$true] %s22_s16  ;;  %s46_s18 = int_to_ptr.vmem [resolvable:$true] %s45_s18 }
  0x16   :  { %s601_s21 = scalar_lea.hbm %s854_s0, 64 }
  0x17   :  { %p602_p8 = scmp.ne.s32.totalorder %s854_s0, %s601_s21  ;;  %p605_p9 = scmp.lt.u32.totalorder %s601_s21, %s854_s0 }
  0x19   :  { %p607_p10 = pnand %p605_p9, %p602_p8 }
  0x1b   :  { %610 = shalt.err (!%p607_p10)
}
  0x1c   :  { %s611_s1 = scalar_lea.vmem %s23_s16, 64  ;;  %p616_p12 = scmp.lt.s32.totalorder %s23_s16, %s23_s16 }
  0x1d   :  { %p612_p11 = scmp.ne.s32.totalorder %s23_s16, %s611_s1  ;;  %p617_p13 = scmp.lt.s32.totalorder %s611_s1, %s611_s1 }
  0x1f   :  { %p618_p0 = por %p617_p13, %p616_p12 }
  0x21   :  { %p619_p1 = pnand %p618_p0, %p612_p11 }
  0x23   :  { %622 = shalt.err (!%p619_p1)
}
  0x24   :  { %25 = dma.hbm_to_vmem [thread:$0]  %s854_s0, 64, %s23_s16, [#allocation3]  }
  0x25   :  { %s623_s30 = scalar_lea.hbm %s857_s3, 1024 }
  0x26   :  { %p624_p2 = scmp.ne.s32.totalorder %s857_s3, %s623_s30  ;;  %p627_p3 = scmp.lt.u32.totalorder %s623_s30, %s857_s3 }
  0x28   :  { %p629_p4 = pnand %p627_p3, %p624_p2 }
  0x2a   :  { %632 = shalt.err (!%p629_p4)
}
  0x2b   :  { %s633_s14 = scalar_lea.vmem %s46_s18, 1024  ;;  %p638_p6 = scmp.lt.s32.totalorder %s46_s18, %s46_s18 }
  0x2c   :  { %p634_p5 = scmp.ne.s32.totalorder %s46_s18, %s633_s14  ;;  %p639_p7 = scmp.lt.s32.totalorder %s633_s14, %s633_s14 }
  0x2e   :  { %p640_p8 = por %p639_p7, %p638_p6 }
  0x30   :  { %p641_p9 = pnand %p640_p8, %p634_p5 }
  0x32   :  { %644 = shalt.err (!%p641_p9)
}
  0x33   :  { %51 = dma.hbm_to_vmem [thread:$0]  %s857_s3, 1024, %s46_s18, [#allocation6], %s698_s11, %s698_s11, %s699_s12  }
  0x34   :  { %s702_s16 = smov [#allocation8]   ;;  %s645_s21 = scalar_lea.hbm %s859_s5, 1024 }
  0x35   :  { %s59_s17 = sshll.u32 %s702_s16, 4  ;;  %p646_p10 = scmp.ne.s32.totalorder %s859_s5, %s645_s21  ;;  %s60_s17 = int_to_ptr.vmem [resolvable:$true] %s59_s17 }
  0x36   :  { %p649_p11 = scmp.lt.u32.totalorder %s645_s21, %s859_s5 }
  0x38   :  { %p651_p12 = pnand %p649_p11, %p646_p10 }
  0x3a   :  { %654 = shalt.err (!%p651_p12)
}
  0x3b   :  { %s655_s1 = scalar_lea.vmem %s60_s17, 1024  ;;  %p660_p0 = scmp.lt.s32.totalorder %s60_s17, %s60_s17 }
  0x3c   :  { %p656_p13 = scmp.ne.s32.totalorder %s60_s17, %s655_s1  ;;  %p661_p1 = scmp.lt.s32.totalorder %s655_s1, %s655_s1 }
  0x3e   :  { %p662_p2 = por %p661_p1, %p660_p0 }
  0x40   :  { %p663_p3 = pnand %p662_p2, %p656_p13 }
  0x42   :  { %666 = shalt.err (!%p663_p3)
}
  0x43   :  { %65 = dma.hbm_to_vmem [thread:$0]  %s859_s5, 1024, %s60_s17, [#allocation9], %s698_s11, %s698_s11, %s699_s12  }
  0x44   :  { %689 = dma.done.wait [#allocation3], 64  }
  0x45   :  { %690 = vsyncadd [#allocation3], 4294967232 }
  0x46   :  { %691 = dma.done.wait [#allocation6], 2048  }
  0x47   :  { %692 = vsyncadd [#allocation6], 4294965248 }
  0x48   :  { %693 = dma.done.wait [#allocation9], 1024  }
  0x49   :  { %694 = vsyncadd [#allocation9], 4294966272  ;;  %v703_v0 = vmov 0.0   ;;  %vm704_vm0 = vmmov 0   ;;  %v555_v1 = vld [vmem:[#allocation5] sm:$0xff]   ;;  %v556_v2 = vld [vmem:[#allocation5 + $0x8] sm:$0xff]   ;;  %v100_v24 = vlaneseq }
  0x4a   :  { %486 = vmatprep.subr.bf16.mxu0 %v703_v0  ;;  %502 = vmatprep.mubr.msk.bf16.mxu0 %vm704_vm0, %v703_v0  ;;  %v557_v3 = vld [vmem:[#allocation5 + $0x10] sm:$0xff]   ;;  %v563_v4 = vld [vmem:[#allocation7] sm:$0xff]   ;;  %v558_v5 = vld [vmem:[#allocation5 + $0x18] sm:$0xff]   ;;  %s705_s28 = smov [#allocation10]  }
  0x4b   :  { %506 = vmatprep.subr.bf16.mxu1 %v703_v0  ;;  %522 = vmatprep.mubr.msk.bf16.mxu1 %vm704_vm0, %v703_v0  ;;  %v564_v6 = vld [vmem:[#allocation7 + $0x8] sm:$0xff]   ;;  %v559_v7 = vld [vmem:[#allocation5 + $0x20] sm:$0xff]   ;;  %v565_v8 = vld [vmem:[#allocation7 + $0x10] sm:$0xff]   ;;  %v101_v25 = vshrl.u32 %v100_v24, 7  ;;  %s424_s29 = sshll.u32 %s705_s28, 4  ;;  %s425_s29 = int_to_ptr.vmem [resolvable:$true] %s424_s29 }
  0x4c   :  { %487 = vmatpush3.bf16.msra.mxu0 %v555_v1  ;;  %507 = vmatpush3.bf16.msra.mxu1 %v563_v4  ;;  %v560_v9 = vld [vmem:[#allocation5 + $0x28] sm:$0xff]   ;;  %v566_v10 = vld [vmem:[#allocation7 + $0x18] sm:$0xff]   ;;  %v561_v11 = vld [vmem:[#allocation5 + $0x30] sm:$0xff]   ;;  %p672_p5 = scmp.lt.s32.totalorder %s425_s29, %s425_s29 }
  0x4d   :  { %488 = vmatprep.subr.bf16.mxu0 %v703_v0  ;;  %508 = vmatprep.subr.bf16.mxu1 %v703_v0  ;;  %v567_v12 = vld [vmem:[#allocation7 + $0x20] sm:$0xff]   ;;  %v562_v13 = vld [vmem:[#allocation5 + $0x38] sm:$0xff]   ;;  %v568_v14 = vld [vmem:[#allocation7 + $0x28] sm:$0xff]   ;;  %v102_v28 = vsub.s32 0, %v101_v25 }
  0x4e   :  { %v81_v15 = vld [vmem:[#allocation2] sm:$0xf]  ;;  %v569_v16 = vld [vmem:[#allocation7 + $0x30] sm:$0xff]   ;;  %v571_v18 = vld [vmem:[#allocation8] sm:$0xff]  }
  0x4f   :  { %v570_v17 = vld [vmem:[#allocation7 + $0x38] sm:$0xff]   ;;  %v572_v19 = vld [vmem:[#allocation8 + $0x8] sm:$0xff]   ;;  %v573_v20 = vld [vmem:[#allocation8 + $0x10] sm:$0xff]  }
  0x50   :  { %489 = vmatpush3.bf16.msra.mxu0 %v556_v2  ;;  %509 = vmatpush3.bf16.msra.mxu1 %v564_v6  ;;  %v574_v21 = vld [vmem:[#allocation8 + $0x18] sm:$0xff]   ;;  %v575_v22 = vld [vmem:[#allocation8 + $0x20] sm:$0xff]   ;;  %v576_v23 = vld [vmem:[#allocation8 + $0x28] sm:$0xff]  }
  0x51   :  { %490 = vmatprep.subr.bf16.mxu0 %v703_v0  ;;  %510 = vmatprep.subr.bf16.mxu1 %v703_v0  ;;  %v98_v26 = vld [vmem:[%s856_s2] sm:$0x1]  ;;  %v577_v37 = vld [vmem:[#allocation8 + $0x30] sm:$0xff]  }
  0x52   :  { %v99_v27 = vunpack.c.l.bf16 %v98_v26  ;;  %v578_v38 = vld [vmem:[#allocation8 + $0x38] sm:$0xff]  }
  0x53   :  { %v210_v39 = vld [vmem:[%s858_s4] sm:$0x1]  ;;  %s667_s4 = scalar_lea.vmem %s425_s29, 64 }
  0x54   :  { %491 = vmatpush3.bf16.msra.mxu0 %v557_v3  ;;  %511 = vmatpush3.bf16.msra.mxu1 %v565_v8  ;;  %v103_v29 = vrot.slane %v99_v27, %v102_v28  ;;  %v211_v40 = vunpack.c.l.bf16 %v210_v39  ;;  %v322_v49 = vld [vmem:[%s860_s6] sm:$0x1]  ;;  %p668_p4 = scmp.ne.s32.totalorder %s425_s29, %s667_s4  ;;  %p673_p6 = scmp.lt.s32.totalorder %s667_s4, %s667_s4 }
  0x55   :  { %492 = vmatprep.subr.bf16.mxu0 %v703_v0  ;;  %512 = vmatprep.subr.bf16.mxu1 %v703_v0  ;;  %v323_v50 = vunpack.c.l.bf16 %v322_v49 }
  0x56   :  { %v215_v41 = vrot.slane %v211_v40, %v102_v28  ;;  %p674_p7 = por %p673_p6, %p672_p5 }
  0x57   :  { %v327_v51 = vrot.slane %v323_v50, %v102_v28 }
  0x58   :  { %493 = vmatpush3.bf16.msra.mxu0 %v558_v5  ;;  %513 = vmatpush3.bf16.msra.mxu1 %v566_v10  ;;  %p675_p8 = pnand %p674_p7, %p668_p4 }
  0x59   :  { %494 = vmatprep.subr.bf16.mxu0 %v703_v0  ;;  %514 = vmatprep.subr.bf16.mxu1 %v703_v0 }
  0x5c   :  { %495 = vmatpush3.bf16.msra.mxu0 %v559_v7  ;;  %515 = vmatpush3.bf16.msra.mxu1 %v567_v12 }
  0x5d   :  { %496 = vmatprep.subr.bf16.mxu0 %v703_v0  ;;  %516 = vmatprep.subr.bf16.mxu1 %v703_v0 }
  0x60   :  { %497 = vmatpush3.bf16.msra.mxu0 %v560_v9  ;;  %517 = vmatpush3.bf16.msra.mxu1 %v568_v14 }
  0x61   :  { %498 = vmatprep.subr.bf16.mxu0 %v703_v0  ;;  %518 = vmatprep.subr.bf16.mxu1 %v703_v0 }
  0x64   :  { %499 = vmatpush3.bf16.msra.mxu0 %v561_v11  ;;  %519 = vmatpush3.bf16.msra.mxu1 %v569_v16 }
  0x65   :  { %500 = vmatprep.subr.bf16.mxu0 %v703_v0  ;;  %520 = vmatprep.subr.bf16.mxu1 %v703_v0 }
  0x68   :  { %501 = vmatpush3.bf16.msra.mxu0 %v562_v13  ;;  %521 = vmatpush3.bf16.msra.mxu1 %v570_v17 }
  0x69   :  { %526 = vmatprep.subr.bf16.mxu0 %v703_v0 }
  0x6b   :  { %503 = vmatmul.mubr.bf16.vlgmr.msra.gmra.mrb[0].mxu0 %v81_v15 }
  0x6c   :  { %542 = vmatprep.mubr.msk.bf16.mxu0 %vm704_vm0, %v703_v0  ;;  %527 = vmatpush3.bf16.msra.mxu0 %v571_v18 }
  0x6d   :  { %528 = vmatprep.subr.bf16.mxu0 %v703_v0 }
  0x70   :  { %529 = vmatpush3.bf16.msra.mxu0 %v572_v19 }
  0x71   :  { %530 = vmatprep.subr.bf16.mxu0 %v703_v0 }
  0x74   :  { %531 = vmatpush3.bf16.msra.mxu0 %v573_v20 }
  0x75   :  { %532 = vmatprep.subr.bf16.mxu0 %v703_v0 }
  0x78   :  { %533 = vmatpush3.bf16.msra.mxu0 %v574_v21 }
  0x79   :  { %534 = vmatprep.subr.bf16.mxu0 %v703_v0 }
  0x7c   :  { %535 = vmatpush3.bf16.msra.mxu0 %v575_v22 }
  0x7d   :  { %536 = vmatprep.subr.bf16.mxu0 %v703_v0 }
  0x80   :  { %537 = vmatpush3.bf16.msra.mxu0 %v576_v23 }
  0x81   :  { %538 = vmatprep.subr.bf16.mxu0 %v703_v0 }
  0x84   :  { %539 = vmatpush3.bf16.msra.mxu0 %v577_v37 }
  0x85   :  { %540 = vmatprep.subr.bf16.mxu0 %v703_v0 }
  0x88   :  { %541 = vmatpush3.bf16.msra.mxu0 %v578_v38 }
 0x13e   :  { %v186_v30 = vpop.f32.mrb[0].mxu0 }
 0x13f   :  { %v187_v31 = vadd.f32 %v186_v30, %v103_v29  ;;  %v504_v32 = vpop.f32.mrb[1].mxu0 }
 0x140   :  { %v189_v33 = vpop.f32.mrb[2].mxu0 }
 0x141   :  { %v192_v34 = vmax.f32 %v187_v31, 0.0  ;;  %v505_v35 = vpop.f32.mrb[3].mxu0 }
 0x143   :  { %v193_v36 = vpack.c.bf16 %v192_v34, %v192_v34 }
 0x145   :  { %523 = vmatmul.mubr.bf16.vlgmr.msra.gmra.mrb[0].mxu1 %v193_v36 }
 0x218   :  { %v298_v42 = vpop.f32.mrb[0].mxu1 }
 0x219   :  { %v299_v43 = vadd.f32 %v298_v42, %v215_v41  ;;  %v524_v44 = vpop.f32.mrb[1].mxu1 }
 0x21a   :  { %v301_v45 = vpop.f32.mrb[2].mxu1 }
 0x21b   :  { %v304_v46 = vmax.f32 %v299_v43, 0.0  ;;  %v525_v47 = vpop.f32.mrb[3].mxu1 }
 0x21d   :  { %v305_v48 = vpack.c.bf16 %v304_v46, %v304_v46 }
 0x21f   :  { %543 = vmatmul.mubr.bf16.vlgmr.msra.gmra.mrb[4].mxu0 %v305_v48 }
 0x2f2   :  { %v410_v52 = vpop.f32.mrb[4].mxu0 }
 0x2f3   :  { %v411_v53 = vadd.f32 %v410_v52, %v327_v51  ;;  %v544_v54 = vpop.f32.mrb[5].mxu0 }
 0x2f4   :  { %v413_v55 = vpop.f32.mrb[6].mxu0 }
 0x2f5   :  { %v416_v56 = vpack.c.bf16 %v411_v53, %v411_v53  ;;  %v545_v57 = vpop.f32.mrb[7].mxu0 }
 0x2f7   :  { %417 = vst [vmem:[#allocation10] sm:$0xf] %v416_v56 }
 0x2f8   :  { %678 = shalt.err (!%p675_p8)
}
 0x2f9   :  { %s679_s8 = scalar_lea.hbm %s861_s7, 64 }
 0x2fa   :  { %p680_p9 = scmp.ne.s32.totalorder %s861_s7, %s679_s8  ;;  %p683_p10 = scmp.lt.u32.totalorder %s679_s8, %s861_s7 }
 0x2fc   :  { %p685_p11 = pnand %p683_p10, %p680_p9 }
 0x2fe   :  { %688 = shalt.err (!%p685_p11)
}
 0x2ff   :  { %427 = dma.vmem_to_hbm [thread:$0]  %s425_s29, 64, %s861_s7, [#allocation4]  }
 0x300   :  { %695 = dma.done.wait [#allocation4], 64  }
 0x301   :  { %696 = vsyncadd [#allocation4], 4294967232 }
 0x302   :  { %431 = vsyncpa [#allocation3], 1 }
 0x303   :  { %432 = vsyncpa [#allocation6], 1 }
 0x304   :  { %433 = vsyncpa [#allocation9], 1 }
 0x305   :  { %434 = vsyncpa [#allocation4], 1 }

// kernel: tpu_custom_call.1
= control target key start
LH: loop header
LB: loop body
LE: loop exit
PB: predicated region body
PF: predicated region fallthrough
CT: control target
= control target key end

     0   :  { %12 = vsyncpa [#allocation3], 0  ;;  %s854_s0 = inlined_call_operand.hbm [shape: bf16[8,128], index: 0, kind: input, shape index: {}]   ;;  %s855_s1 = inlined_call_operand.hbm [shape: bf16[128,128], index: 1, kind: input, shape index: {}]   ;;  %s856_s2 = inlined_call_operand.vmem [shape: bf16[1,128], index: 2, kind: input, shape index: {}]   ;;  %s857_s3 = inlined_call_operand.hbm [shape: bf16[128,128], index: 3, kind: input, shape index: {}]   ;;  %s858_s4 = inlined_call_operand.vmem [shape: bf16[1,128], index: 4, kind: input, shape index: {}]   ;;  %s859_s5 = inlined_call_operand.hbm [shape: bf16[128,128], index: 5, kind: input, shape index: {}]   ;;  %s860_s6 = inlined_call_operand.vmem [shape: bf16[1,128], index: 6, kind: input, shape index: {}]   ;;  %s861_s7 = inlined_call_operand.hbm [shape: bf16[8,128], index: 7, kind: output, shape index: {}]  }
   0x1   :  { %13 = vsyncpa [#allocation6], 0 }
   0x2   :  { %14 = vsyncpa [#allocation9], 0 }
   0x3   :  { %15 = vsyncpa [#allocation4], 0  ;;  %s697_s24 = smov [#allocation5]   ;;  %s579_s28 = scalar_lea.hbm %s855_s1, 1024 }
   0x4   :  { %s31_s25 = sshll.u32 %s697_s24, 4  ;;  %p580_p0 = scmp.ne.s32.totalorder %s855_s1, %s579_s28  ;;  %s32_s25 = int_to_ptr.vmem [resolvable:$true] %s31_s25 }
   0x5   :  { %p583_p1 = scmp.lt.u32.totalorder %s579_s28, %s855_s1 }
   0x7   :  { %p585_p2 = pnand %p583_p1, %p580_p0 }
   0x9   :  { %588 = shalt.err (!%p585_p2)
}
   0xa   :  { %s589_s10 = scalar_lea.vmem %s32_s25, 1024  ;;  %p594_p4 = scmp.lt.s32.totalorder %s32_s25, %s32_s25 }
   0xb   :  { %p590_p3 = scmp.ne.s32.totalorder %s32_s25, %s589_s10  ;;  %p595_p5 = scmp.lt.s32.totalorder %s589_s10, %s589_s10 }
   0xd   :  { %p596_p6 = por %p595_p5, %p594_p4 }
   0xf   :  { %p597_p7 = pnand %p596_p6, %p590_p3 }
  0x11   :  { %600 = shalt.err (!%p597_p7)
}
  0x12   :  { %s698_s11 = smov 64   ;;  %s699_s12 = smov 4  }
  0x13   :  { %37 = dma.hbm_to_vmem [thread:$0]  %s855_s1, 1024, %s32_s25, [#allocation6], %s698_s11, %s698_s11, %s699_s12  }
  0x14   :  { %s700_s15 = smov [#allocation2]   ;;  %s701_s17 = smov [#allocation7]  }
  0x15   :  { %s22_s16 = sshll.u32 %s700_s15, 4  ;;  %s45_s18 = sshll.u32 %s701_s17, 4  ;;  %s23_s16 = int_to_ptr.vmem [resolvable:$true] %s22_s16  ;;  %s46_s18 = int_to_ptr.vmem [resolvable:$true] %s45_s18 }
  0x16   :  { %s601_s21 = scalar_lea.hbm %s854_s0, 64 }
  0x17   :  { %p602_p8 = scmp.ne.s32.totalorder %s854_s0, %s601_s21  ;;  %p605_p9 = scmp.lt.u32.totalorder %s601_s21, %s854_s0 }
  0x19   :  { %p607_p10 = pnand %p605_p9, %p602_p8 }
  0x1b   :  { %610 = shalt.err (!%p607_p10)
}
  0x1c   :  { %s611_s1 = scalar_lea.vmem %s23_s16, 64  ;;  %p616_p12 = scmp.lt.s32.totalorder %s23_s16, %s23_s16 }
  0x1d   :  { %p612_p11 = scmp.ne.s32.totalorder %s23_s16, %s611_s1  ;;  %p617_p13 = scmp.lt.s32.totalorder %s611_s1, %s611_s1 }
  0x1f   :  { %p618_p0 = por %p617_p13, %p616_p12 }
  0x21   :  { %p619_p1 = pnand %p618_p0, %p612_p11 }
  0x23   :  { %622 = shalt.err (!%p619_p1)
}
  0x24   :  { %25 = dma.hbm_to_vmem [thread:$0]  %s854_s0, 64, %s23_s16, [#allocation3]  }
  0x25   :  { %s623_s30 = scalar_lea.hbm %s857_s3, 1024 }
  0x26   :  { %p624_p2 = scmp.ne.s32.totalorder %s857_s3, %s623_s30  ;;  %p627_p3 = scmp.lt.u32.totalorder %s623_s30, %s857_s3 }
  0x28   :  { %p629_p4 = pnand %p627_p3, %p624_p2 }
  0x2a   :  { %632 = shalt.err (!%p629_p4)
}
  0x2b   :  { %s633_s14 = scalar_lea.vmem %s46_s18, 1024  ;;  %p638_p6 = scmp.lt.s32.totalorder %s46_s18, %s46_s18 }
  0x2c   :  { %p634_p5 = scmp.ne.s32.totalorder %s46_s18, %s633_s14  ;;  %p639_p7 = scmp.lt.s32.totalorder %s633_s14, %s633_s14 }
  0x2e   :  { %p640_p8 = por %p639_p7, %p638_p6 }
  0x30   :  { %p641_p9 = pnand %p640_p8, %p634_p5 }
  0x32   :  { %644 = shalt.err (!%p641_p9)
}
  0x33   :  { %51 = dma.hbm_to_vmem [thread:$0]  %s857_s3, 1024, %s46_s18, [#allocation6], %s698_s11, %s698_s11, %s699_s12  }
  0x34   :  { %s702_s16 = smov [#allocation8]   ;;  %s645_s21 = scalar_lea.hbm %s859_s5, 1024 }
  0x35   :  { %s59_s17 = sshll.u32 %s702_s16, 4  ;;  %p646_p10 = scmp.ne.s32.totalorder %s859_s5, %s645_s21  ;;  %s60_s17 = int_to_ptr.vmem [resolvable:$true] %s59_s17 }
  0x36   :  { %p649_p11 = scmp.lt.u32.totalorder %s645_s21, %s859_s5 }
  0x38   :  { %p651_p12 = pnand %p649_p11, %p646_p10 }
  0x3a   :  { %654 = shalt.err (!%p651_p12)
}
  0x3b   :  { %s655_s1 = scalar_lea.vmem %s60_s17, 1024  ;;  %p660_p0 = scmp.lt.s32.totalorder %s60_s17, %s60_s17 }
  0x3c   :  { %p656_p13 = scmp.ne.s32.totalorder %s60_s17, %s655_s1  ;;  %p661_p1 = scmp.lt.s32.totalorder %s655_s1, %s655_s1 }
  0x3e   :  { %p662_p2 = por %p661_p1, %p660_p0 }
  0x40   :  { %p663_p3 = pnand %p662_p2, %p656_p13 }
  0x42   :  { %666 = shalt.err (!%p663_p3)
}
  0x43   :  { %65 = dma.hbm_to_vmem [thread:$0]  %s859_s5, 1024, %s60_s17, [#allocation9], %s698_s11, %s698_s11, %s699_s12  }
  0x44   :  { %689 = dma.done.wait [#allocation3], 64  }
  0x45   :  { %690 = vsyncadd [#allocation3], 4294967232 }
  0x46   :  { %691 = dma.done.wait [#allocation6], 2048  }
  0x47   :  { %692 = vsyncadd [#allocation6], 4294965248 }
  0x48   :  { %693 = dma.done.wait [#allocation9], 1024  }
  0x49   :  { %694 = vsyncadd [#allocation9], 4294966272  ;;  %v703_v0 = vmov 0.0   ;;  %vm704_vm0 = vmmov 0   ;;  %v555_v1 = vld [vmem:[#allocation5] sm:$0xff]   ;;  %v556_v2 = vld [vmem:[#allocation5 + $0x8] sm:$0xff]   ;;  %v100_v24 = vlaneseq }
  0x4a   :  { %486 = vmatprep.subr.bf16.mxu0 %v703_v0  ;;  %502 = vmatprep.mubr.msk.bf16.mxu0 %vm704_vm0, %v703_v0  ;;  %v557_v3 = vld [vmem:[#allocation5 + $0x10] sm:$0xff]   ;;  %v563_v4 = vld [vmem:[#allocation7] sm:$0xff]   ;;  %v558_v5 = vld [vmem:[#allocation5 + $0x18] sm:$0xff]   ;;  %s705_s28 = smov [#allocation10]  }
  0x4b   :  { %506 = vmatprep.subr.bf16.mxu1 %v703_v0  ;;  %522 = vmatprep.mubr.msk.bf16.mxu1 %vm704_vm0, %v703_v0  ;;  %v564_v6 = vld [vmem:[#allocation7 + $0x8] sm:$0xff]   ;;  %v559_v7 = vld [vmem:[#allocation5 + $0x20] sm:$0xff]   ;;  %v565_v8 = vld [vmem:[#allocation7 + $0x10] sm:$0xff]   ;;  %v101_v25 = vshrl.u32 %v100_v24, 7  ;;  %s424_s29 = sshll.u32 %s705_s28, 4  ;;  %s425_s29 = int_to_ptr.vmem [resolvable:$true] %s424_s29 }
  0x4c   :  { %487 = vmatpush3.bf16.msra.mxu0 %v555_v1  ;;  %507 = vmatpush3.bf16.msra.mxu1 %v563_v4  ;;  %v560_v9 = vld [vmem:[#allocation5 + $0x28] sm:$0xff]   ;;  %v566_v10 = vld [vmem:[#allocation7 + $0x18] sm:$0xff]   ;;  %v561_v11 = vld [vmem:[#allocation5 + $0x30] sm:$0xff]   ;;  %p672_p5 = scmp.lt.s32.totalorder %s425_s29, %s425_s29 }
  0x4d   :  { %488 = vmatprep.subr.bf16.mxu0 %v703_v0  ;;  %508 = vmatprep.subr.bf16.mxu1 %v703_v0  ;;  %v567_v12 = vld [vmem:[#allocation7 + $0x20] sm:$0xff]   ;;  %v562_v13 = vld [vmem:[#allocation5 + $0x38] sm:$0xff]   ;;  %v568_v14 = vld [vmem:[#allocation7 + $0x28] sm:$0xff]   ;;  %v102_v28 = vsub.s32 0, %v101_v25 }
  0x4e   :  { %v81_v15 = vld [vmem:[#allocation2] sm:$0xf]  ;;  %v569_v16 = vld [vmem:[#allocation7 + $0x30] sm:$0xff]   ;;  %v571_v18 = vld [vmem:[#allocation8] sm:$0xff]  }
  0x4f   :  { %v570_v17 = vld [vmem:[#allocation7 + $0x38] sm:$0xff]   ;;  %v572_v19 = vld [vmem:[#allocation8 + $0x8] sm:$0xff]   ;;  %v573_v20 = vld [vmem:[#allocation8 + $0x10] sm:$0xff]  }
  0x50   :  { %489 = vmatpush3.bf16.msra.mxu0 %v556_v2  ;;  %509 = vmatpush3.bf16.msra.mxu1 %v564_v6  ;;  %v574_v21 = vld [vmem:[#allocation8 + $0x18] sm:$0xff]   ;;  %v575_v22 = vld [vmem:[#allocation8 + $0x20] sm:$0xff]   ;;  %v576_v23 = vld [vmem:[#allocation8 + $0x28] sm:$0xff]  }
  0x51   :  { %490 = vmatprep.subr.bf16.mxu0 %v703_v0  ;;  %510 = vmatprep.subr.bf16.mxu1 %v703_v0  ;;  %v98_v26 = vld [vmem:[%s856_s2] sm:$0x1]  ;;  %v577_v37 = vld [vmem:[#allocation8 + $0x30] sm:$0xff]  }
  0x52   :  { %v99_v27 = vunpack.c.l.bf16 %v98_v26  ;;  %v578_v38 = vld [vmem:[#allocation8 + $0x38] sm:$0xff]  }
  0x53   :  { %v210_v39 = vld [vmem:[%s858_s4] sm:$0x1]  ;;  %s667_s4 = scalar_lea.vmem %s425_s29, 64 }
  0x54   :  { %491 = vmatpush3.bf16.msra.mxu0 %v557_v3  ;;  %511 = vmatpush3.bf16.msra.mxu1 %v565_v8  ;;  %v103_v29 = vrot.slane %v99_v27, %v102_v28  ;;  %v211_v40 = vunpack.c.l.bf16 %v210_v39  ;;  %v322_v49 = vld [vmem:[%s860_s6] sm:$0x1]  ;;  %p668_p4 = scmp.ne.s32.totalorder %s425_s29, %s667_s4  ;;  %p673_p6 = scmp.lt.s32.totalorder %s667_s4, %s667_s4 }
  0x55   :  { %492 = vmatprep.subr.bf16.mxu0 %v703_v0  ;;  %512 = vmatprep.subr.bf16.mxu1 %v703_v0  ;;  %v323_v50 = vunpack.c.l.bf16 %v322_v49 }
  0x56   :  { %v215_v41 = vrot.slane %v211_v40, %v102_v28  ;;  %p674_p7 = por %p673_p6, %p672_p5 }
  0x57   :  { %v327_v51 = vrot.slane %v323_v50, %v102_v28 }
  0x58   :  { %493 = vmatpush3.bf16.msra.mxu0 %v558_v5  ;;  %513 = vmatpush3.bf16.msra.mxu1 %v566_v10  ;;  %p675_p8 = pnand %p674_p7, %p668_p4 }
  0x59   :  { %494 = vmatprep.subr.bf16.mxu0 %v703_v0  ;;  %514 = vmatprep.subr.bf16.mxu1 %v703_v0 }
  0x5c   :  { %495 = vmatpush3.bf16.msra.mxu0 %v559_v7  ;;  %515 = vmatpush3.bf16.msra.mxu1 %v567_v12 }
  0x5d   :  { %496 = vmatprep.subr.bf16.mxu0 %v703_v0  ;;  %516 = vmatprep.subr.bf16.mxu1 %v703_v0 }
  0x60   :  { %497 = vmatpush3.bf16.msra.mxu0 %v560_v9  ;;  %517 = vmatpush3.bf16.msra.mxu1 %v568_v14 }
  0x61   :  { %498 = vmatprep.subr.bf16.mxu0 %v703_v0  ;;  %518 = vmatprep.subr.bf16.mxu1 %v703_v0 }
  0x64   :  { %499 = vmatpush3.bf16.msra.mxu0 %v561_v11  ;;  %519 = vmatpush3.bf16.msra.mxu1 %v569_v16 }
  0x65   :  { %500 = vmatprep.subr.bf16.mxu0 %v703_v0  ;;  %520 = vmatprep.subr.bf16.mxu1 %v703_v0 }
  0x68   :  { %501 = vmatpush3.bf16.msra.mxu0 %v562_v13  ;;  %521 = vmatpush3.bf16.msra.mxu1 %v570_v17 }
  0x69   :  { %526 = vmatprep.subr.bf16.mxu0 %v703_v0 }
  0x6b   :  { %503 = vmatmul.mubr.bf16.vlgmr.msra.gmra.mrb[0].mxu0 %v81_v15 }
  0x6c   :  { %542 = vmatprep.mubr.msk.bf16.mxu0 %vm704_vm0, %v703_v0  ;;  %527 = vmatpush3.bf16.msra.mxu0 %v571_v18 }
  0x6d   :  { %528 = vmatprep.subr.bf16.mxu0 %v703_v0 }
  0x70   :  { %529 = vmatpush3.bf16.msra.mxu0 %v572_v19 }
  0x71   :  { %530 = vmatprep.subr.bf16.mxu0 %v703_v0 }
  0x74   :  { %531 = vmatpush3.bf16.msra.mxu0 %v573_v20 }
  0x75   :  { %532 = vmatprep.subr.bf16.mxu0 %v703_v0 }
  0x78   :  { %533 = vmatpush3.bf16.msra.mxu0 %v574_v21 }
  0x79   :  { %534 = vmatprep.subr.bf16.mxu0 %v703_v0 }
  0x7c   :  { %535 = vmatpush3.bf16.msra.mxu0 %v575_v22 }
  0x7d   :  { %536 = vmatprep.subr.bf16.mxu0 %v703_v0 }
  0x80   :  { %537 = vmatpush3.bf16.msra.mxu0 %v576_v23 }
  0x81   :  { %538 = vmatprep.subr.bf16.mxu0 %v703_v0 }
  0x84   :  { %539 = vmatpush3.bf16.msra.mxu0 %v577_v37 }
  0x85   :  { %540 = vmatprep.subr.bf16.mxu0 %v703_v0 }
  0x88   :  { %541 = vmatpush3.bf16.msra.mxu0 %v578_v38 }
 0x13e   :  { %v186_v30 = vpop.f32.mrb[0].mxu0 }
 0x13f   :  { %v187_v31 = vadd.f32 %v186_v30, %v103_v29  ;;  %v504_v32 = vpop.f32.mrb[1].mxu0 }
 0x140   :  { %v189_v33 = vpop.f32.mrb[2].mxu0 }
 0x141   :  { %v192_v34 = vmax.f32 %v187_v31, 0.0  ;;  %v505_v35 = vpop.f32.mrb[3].mxu0 }
 0x143   :  { %v193_v36 = vpack.c.bf16 %v192_v34, %v192_v34 }
 0x145   :  { %523 = vmatmul.mubr.bf16.vlgmr.msra.gmra.mrb[0].mxu1 %v193_v36 }
 0x218   :  { %v298_v42 = vpop.f32.mrb[0].mxu1 }
 0x219   :  { %v299_v43 = vadd.f32 %v298_v42, %v215_v41  ;;  %v524_v44 = vpop.f32.mrb[1].mxu1 }
 0x21a   :  { %v301_v45 = vpop.f32.mrb[2].mxu1 }
 0x21b   :  { %v304_v46 = vmax.f32 %v299_v43, 0.0  ;;  %v525_v47 = vpop.f32.mrb[3].mxu1 }
 0x21d   :  { %v305_v48 = vpack.c.bf16 %v304_v46, %v304_v46 }
 0x21f   :  { %543 = vmatmul.mubr.bf16.vlgmr.msra.gmra.mrb[4].mxu0 %v305_v48 }
 0x2f2   :  { %v410_v52 = vpop.f32.mrb[4].mxu0 }
 0x2f3   :  { %v411_v53 = vadd.f32 %v410_v52, %v327_v51  ;;  %v544_v54 = vpop.f32.mrb[5].mxu0 }
 0x2f4   :  { %v413_v55 = vpop.f32.mrb[6].mxu0 }
 0x2f5   :  { %v416_v56 = vpack.c.bf16 %v411_v53, %v411_v53  ;;  %v545_v57 = vpop.f32.mrb[7].mxu0 }
 0x2f7   :  { %417 = vst [vmem:[#allocation10] sm:$0xf] %v416_v56 }
 0x2f8   :  { %678 = shalt.err (!%p675_p8)
}
 0x2f9   :  { %s679_s8 = scalar_lea.hbm %s861_s7, 64 }
 0x2fa   :  { %p680_p9 = scmp.ne.s32.totalorder %s861_s7, %s679_s8  ;;  %p683_p10 = scmp.lt.u32.totalorder %s679_s8, %s861_s7 }
 0x2fc   :  { %p685_p11 = pnand %p683_p10, %p680_p9 }
 0x2fe   :  { %688 = shalt.err (!%p685_p11)
}
 0x2ff   :  { %427 = dma.vmem_to_hbm [thread:$0]  %s425_s29, 64, %s861_s7, [#allocation4]  }
 0x300   :  { %695 = dma.done.wait [#allocation4], 64  }
 0x301   :  { %696 = vsyncadd [#allocation4], 4294967232 }
 0x302   :  { %431 = vsyncpa [#allocation3], 1 }
 0x303   :  { %432 = vsyncpa [#allocation6], 1 }
 0x304   :  { %433 = vsyncpa [#allocation9], 1 }
 0x305   :  { %434 = vsyncpa [#allocation4], 1 }

</bundles_post_ra>
